<compile_context>
chip_gen: v5e
topology: v5e:2x2
jax: 0.10.0
libtpu: 0.0.40
codegen_flags: <defaults>
</compile_context>

<pallas_src>
import jax
import jax.numpy as jnp
from jax.experimental import pallas as pl
from jax.experimental.pallas import tpu as pltpu


def _round_up(x, m):
    return ((x + m - 1) // m) * m


def my_rnn_forward(tokens, emb_table, w_ih, w_hh, b_ih, b_hh, w_fc, b_fc):
    """Forward pass of my_RNN (emb -> RNN(tanh) -> fc(last step) -> softmax).

    Weight layouts are math-layout: w_ih (E, H), w_hh (H, H), w_fc (H, O).
    NOTE: PyTorch stores nn.RNN.weight_ih_l0 as (H, E), weight_hh_l0 as (H, H)
    and nn.Linear.weight as (O, H); transpose when importing real weights.
    """
    B, T = tokens.shape
    E = emb_table.shape[1]
    H = w_ih.shape[1]
    O = w_fc.shape[1]

    # Lane/sublane-dense padding (sliced back after the call): hidden and
    # output dims to multiples of 128 lanes, batch to multiples of 8 sublanes.
    Hp = _round_up(H, 128)
    Op = _round_up(O, 128)
    Bp = _round_up(B, 8)

    # ---------------- XLA glue: time-major embedding gather ----------------
    emb_tm = jnp.take(emb_table, tokens.T, axis=0)            # (T, B, E)
    emb_tm = jnp.pad(emb_tm, ((0, 0), (0, Bp - B), (0, 0)))   # (T, Bp, E)
    emb2d = emb_tm.reshape(T * Bp, E)                         # (T*Bp, E)

    # ---------------- one-time parameter padding / fusion ------------------
    wih_p = jnp.zeros((E, Hp), jnp.float32).at[:, :H].set(w_ih)
    whh_p = jnp.zeros((Hp, Hp), jnp.float32).at[:H, :H].set(w_hh)
    # Fold the two RNN biases into a single bias added to the input projection.
    brnn_p = jnp.zeros((1, Hp), jnp.float32).at[:, :H].set(b_ih + b_hh)
    wfc_p = jnp.zeros((Hp, Op), jnp.float32).at[:H, :O].set(w_fc)
    # Padded output lanes get a very negative bias so softmax ignores them.
    bfc_p = jnp.full((1, Op), -1e30, jnp.float32).at[:, :O].set(b_fc)

    def kernel(emb_ref, wih_ref, whh_ref, brnn_ref, wfc_ref, bfc_ref, out_ref):
        # Hoisted input projection: one (T*Bp, E) @ (E, Hp) MXU matmul for all
        # time steps, instead of re-issuing the E=300 contraction every step.
        xw = (jnp.dot(emb_ref[...], wih_ref[...],
                      preferred_element_type=jnp.float32)
              + brnn_ref[...])                                # (T*Bp, Hp)
        whh = whh_ref[...]

        # initHidden(): zeros.  Fully-unrolled recurrence (T is small/static),
        # only the tiny Hp x Hp matmul remains on the serial chain.
        h = jnp.zeros((Bp, Hp), jnp.float32)
        for t in range(T):
            x_t = xw[t * Bp:(t + 1) * Bp, :]                  # static (Bp, Hp) slice
            h = jnp.tanh(x_t + jnp.dot(h, whh,
                                       preferred_element_type=jnp.float32))

        # fc on last hidden state + softmax(dim=1) (lane-dense (Bp, Op) store).
        logits = (jnp.dot(h, wfc_ref[...],
                          preferred_element_type=jnp.float32) + bfc_ref[...])
        m = jnp.max(logits, axis=1, keepdims=True)
        e = jnp.exp(logits - m)
        inv = pl.reciprocal(jnp.sum(e, axis=1, keepdims=True), approx=True)
        out_ref[...] = e * inv

    out_p = pl.pallas_call(
        kernel,
        out_shape=jax.ShapeDtypeStruct((Bp, Op), jnp.float32),
        # No grid: everything (<400 KB total) lives in VMEM, loaded once,
        # no per-timestep pipeline bookkeeping and no pointless double-buffers.
        in_specs=[pl.BlockSpec(memory_space=pltpu.MemorySpace.VMEM)] * 6,
        out_specs=pl.BlockSpec(memory_space=pltpu.MemorySpace.VMEM),
    )(emb2d, wih_p, whh_p, brnn_p, wfc_p, bfc_p)

    return out_p[:B, :O]


if __name__ == "__main__":
    # Module hyper-parameters (small, consistent with my_RNN __init__)
    hidden_size = 32
    output_size = 4
    vocab_size = 100
    padding_idx = 0
    emb_dim = 300          # fixed at 300 in the module
    batch = 2
    seq_len = 8

    key = jax.random.PRNGKey(0)
    k_tok, k_emb, k_wih, k_whh, k_bih, k_bhh, k_wfc, k_bfc = jax.random.split(key, 8)

    # Deterministic synthetic parameters
    emb_table = jax.random.normal(k_emb, (vocab_size, emb_dim), jnp.float32) * 0.1
    emb_table = emb_table.at[padding_idx].set(0.0)   # padding_idx row is zero

    w_ih = jax.random.normal(k_wih, (emb_dim, hidden_size), jnp.float32) * 0.05
    w_hh = jax.random.normal(k_whh, (hidden_size, hidden_size), jnp.float32) * 0.05
    b_ih = jax.random.normal(k_bih, (1, hidden_size), jnp.float32) * 0.05
    b_hh = jax.random.normal(k_bhh, (1, hidden_size), jnp.float32) * 0.05
    w_fc = jax.random.normal(k_wfc, (hidden_size, output_size), jnp.float32) * 0.1
    b_fc = jax.random.normal(k_bfc, (1, output_size), jnp.float32) * 0.1

    # Example token input (B, T) with a padding token at the sequence end
    tokens = jax.random.randint(k_tok, (batch, seq_len), 0, vocab_size, jnp.int32)
    tokens = tokens.at[0, -1].set(padding_idx)

    out = my_rnn_forward(tokens, emb_table, w_ih, w_hh, b_ih, b_hh, w_fc, b_fc)
    out = jax.block_until_ready(out)

    # Pure-JAX reference of the PyTorch forward for a correctness check
    def ref_forward(toks):
        emb = jnp.take(emb_table, toks, axis=0)               # (B, T, E)
        h = jnp.zeros((batch, hidden_size), jnp.float32)
        for t in range(seq_len):
            h = jnp.tanh(emb[:, t, :] @ w_ih + b_ih + h @ w_hh + b_hh)
        logits = h @ w_fc + b_fc
        return jax.nn.softmax(logits, axis=1)

    ref = jax.block_until_ready(ref_forward(tokens))

    assert out.shape == (batch, output_size)
    # Softmax rows sum to 1 (approx reciprocal -> loose tolerance)
    assert bool(jnp.allclose(jnp.sum(out, axis=1), 1.0, atol=2e-3))
    assert bool(jnp.allclose(out, ref, atol=2e-3, rtol=2e-3))
    print("KERNEL_OK")
</pallas_src>

<mosaic_0001>
module attributes {stable_mosaic.version = 11 : i64} {
  func.func @kernel(%arg0: memref<64x300xf32, #tpu.memory_space<vmem>>, %arg1: memref<300x128xf32, #tpu.memory_space<vmem>>, %arg2: memref<128x128xf32, #tpu.memory_space<vmem>>, %arg3: memref<1x128xf32, #tpu.memory_space<vmem>>, %arg4: memref<128x128xf32, #tpu.memory_space<vmem>>, %arg5: memref<1x128xf32, #tpu.memory_space<vmem>>, %arg6: memref<8x128xf32, #tpu.memory_space<vmem>>) attributes {dimension_semantics = [], scalar_prefetch = 0 : i64, scratch_operands = 0 : i64, tpu.core_type = #tpu.core_type<tc>} {
    %c0 = arith.constant 0 : index
    %c0_0 = arith.constant 0 : index
    %0 = vector.load %arg0[%c0, %c0_0] : memref<64x300xf32, #tpu.memory_space<vmem>>, vector<64x300xf32>
    %c0_1 = arith.constant 0 : index
    %c0_2 = arith.constant 0 : index
    %1 = vector.load %arg1[%c0_1, %c0_2] : memref<300x128xf32, #tpu.memory_space<vmem>>, vector<300x128xf32>
    %cst = arith.constant dense<0.000000e+00> : vector<64x128xf32>
    %2 = tpu.matmul %0, %1, %cst {dimension_numbers = #tpu.dot_dimension_numbers<[1], [0], [0], [1], [0, 0, 1, 1], [], []>} : vector<64x300xf32>, vector<300x128xf32>, vector<64x128xf32> -> vector<64x128xf32>
    %c0_3 = arith.constant 0 : index
    %c0_4 = arith.constant 0 : index
    %3 = vector.load %arg3[%c0_3, %c0_4] : memref<1x128xf32, #tpu.memory_space<vmem>>, vector<1x128xf32>
    %4 = vector.broadcast %3 : vector<1x128xf32> to vector<64x128xf32>
    %5 = arith.addf %2, %4 : vector<64x128xf32>
    %c0_5 = arith.constant 0 : index
    %c0_6 = arith.constant 0 : index
    %6 = vector.load %arg2[%c0_5, %c0_6] : memref<128x128xf32, #tpu.memory_space<vmem>>, vector<128x128xf32>
    %cst_7 = arith.constant 0.000000e+00 : f32
    %7 = vector.broadcast %cst_7 : f32 to vector<8x128xf32>
    %8 = vector.extract_strided_slice %5 {offsets = [0, 0], sizes = [8, 128], strides = [1, 1]} : vector<64x128xf32> to vector<8x128xf32>
    %cst_8 = arith.constant dense<0.000000e+00> : vector<8x128xf32>
    %9 = tpu.matmul %7, %6, %cst_8 {dimension_numbers = #tpu.dot_dimension_numbers<[1], [0], [0], [1], [0, 0, 1, 1], [], []>} : vector<8x128xf32>, vector<128x128xf32>, vector<8x128xf32> -> vector<8x128xf32>
    %10 = arith.addf %8, %9 : vector<8x128xf32>
    %11 = math.tanh %10 : vector<8x128xf32>
    %12 = vector.extract_strided_slice %5 {offsets = [8, 0], sizes = [8, 128], strides = [1, 1]} : vector<64x128xf32> to vector<8x128xf32>
    %cst_9 = arith.constant dense<0.000000e+00> : vector<8x128xf32>
    %13 = tpu.matmul %11, %6, %cst_9 {dimension_numbers = #tpu.dot_dimension_numbers<[1], [0], [0], [1], [0, 0, 1, 1], [], []>} : vector<8x128xf32>, vector<128x128xf32>, vector<8x128xf32> -> vector<8x128xf32>
    %14 = arith.addf %12, %13 : vector<8x128xf32>
    %15 = math.tanh %14 : vector<8x128xf32>
    %16 = vector.extract_strided_slice %5 {offsets = [16, 0], sizes = [8, 128], strides = [1, 1]} : vector<64x128xf32> to vector<8x128xf32>
    %cst_10 = arith.constant dense<0.000000e+00> : vector<8x128xf32>
    %17 = tpu.matmul %15, %6, %cst_10 {dimension_numbers = #tpu.dot_dimension_numbers<[1], [0], [0], [1], [0, 0, 1, 1], [], []>} : vector<8x128xf32>, vector<128x128xf32>, vector<8x128xf32> -> vector<8x128xf32>
    %18 = arith.addf %16, %17 : vector<8x128xf32>
    %19 = math.tanh %18 : vector<8x128xf32>
    %20 = vector.extract_strided_slice %5 {offsets = [24, 0], sizes = [8, 128], strides = [1, 1]} : vector<64x128xf32> to vector<8x128xf32>
    %cst_11 = arith.constant dense<0.000000e+00> : vector<8x128xf32>
    %21 = tpu.matmul %19, %6, %cst_11 {dimension_numbers = #tpu.dot_dimension_numbers<[1], [0], [0], [1], [0, 0, 1, 1], [], []>} : vector<8x128xf32>, vector<128x128xf32>, vector<8x128xf32> -> vector<8x128xf32>
    %22 = arith.addf %20, %21 : vector<8x128xf32>
    %23 = math.tanh %22 : vector<8x128xf32>
    %24 = vector.extract_strided_slice %5 {offsets = [32, 0], sizes = [8, 128], strides = [1, 1]} : vector<64x128xf32> to vector<8x128xf32>
    %cst_12 = arith.constant dense<0.000000e+00> : vector<8x128xf32>
    %25 = tpu.matmul %23, %6, %cst_12 {dimension_numbers = #tpu.dot_dimension_numbers<[1], [0], [0], [1], [0, 0, 1, 1], [], []>} : vector<8x128xf32>, vector<128x128xf32>, vector<8x128xf32> -> vector<8x128xf32>
    %26 = arith.addf %24, %25 : vector<8x128xf32>
    %27 = math.tanh %26 : vector<8x128xf32>
    %28 = vector.extract_strided_slice %5 {offsets = [40, 0], sizes = [8, 128], strides = [1, 1]} : vector<64x128xf32> to vector<8x128xf32>
    %cst_13 = arith.constant dense<0.000000e+00> : vector<8x128xf32>
    %29 = tpu.matmul %27, %6, %cst_13 {dimension_numbers = #tpu.dot_dimension_numbers<[1], [0], [0], [1], [0, 0, 1, 1], [], []>} : vector<8x128xf32>, vector<128x128xf32>, vector<8x128xf32> -> vector<8x128xf32>
    %30 = arith.addf %28, %29 : vector<8x128xf32>
    %31 = math.tanh %30 : vector<8x128xf32>
    %32 = vector.extract_strided_slice %5 {offsets = [48, 0], sizes = [8, 128], strides = [1, 1]} : vector<64x128xf32> to vector<8x128xf32>
    %cst_14 = arith.constant dense<0.000000e+00> : vector<8x128xf32>
    %33 = tpu.matmul %31, %6, %cst_14 {dimension_numbers = #tpu.dot_dimension_numbers<[1], [0], [0], [1], [0, 0, 1, 1], [], []>} : vector<8x128xf32>, vector<128x128xf32>, vector<8x128xf32> -> vector<8x128xf32>
    %34 = arith.addf %32, %33 : vector<8x128xf32>
    %35 = math.tanh %34 : vector<8x128xf32>
    %36 = vector.extract_strided_slice %5 {offsets = [56, 0], sizes = [8, 128], strides = [1, 1]} : vector<64x128xf32> to vector<8x128xf32>
    %cst_15 = arith.constant dense<0.000000e+00> : vector<8x128xf32>
    %37 = tpu.matmul %35, %6, %cst_15 {dimension_numbers = #tpu.dot_dimension_numbers<[1], [0], [0], [1], [0, 0, 1, 1], [], []>} : vector<8x128xf32>, vector<128x128xf32>, vector<8x128xf32> -> vector<8x128xf32>
    %38 = arith.addf %36, %37 : vector<8x128xf32>
    %39 = math.tanh %38 : vector<8x128xf32>
    %c0_16 = arith.constant 0 : index
    %c0_17 = arith.constant 0 : index
    %40 = vector.load %arg4[%c0_16, %c0_17] : memref<128x128xf32, #tpu.memory_space<vmem>>, vector<128x128xf32>
    %cst_18 = arith.constant dense<0.000000e+00> : vector<8x128xf32>
    %41 = tpu.matmul %39, %40, %cst_18 {dimension_numbers = #tpu.dot_dimension_numbers<[1], [0], [0], [1], [0, 0, 1, 1], [], []>} : vector<8x128xf32>, vector<128x128xf32>, vector<8x128xf32> -> vector<8x128xf32>
    %c0_19 = arith.constant 0 : index
    %c0_20 = arith.constant 0 : index
    %42 = vector.load %arg5[%c0_19, %c0_20] : memref<1x128xf32, #tpu.memory_space<vmem>>, vector<1x128xf32>
    %43 = vector.broadcast %42 : vector<1x128xf32> to vector<8x128xf32>
    %44 = arith.addf %41, %43 : vector<8x128xf32>
    %cst_21 = arith.constant dense<0xFF800000> : vector<8xf32>
    %45 = vector.multi_reduction <maximumf>, %44, %cst_21 [1] : vector<8x128xf32> to vector<8xf32>
    %46 = vector.shape_cast %45 : vector<8xf32> to vector<8x1xf32>
    %47 = vector.broadcast %46 : vector<8x1xf32> to vector<8x128xf32>
    %48 = arith.subf %44, %47 : vector<8x128xf32>
    %49 = math.exp %48 : vector<8x128xf32>
    %cst_22 = arith.constant dense<0.000000e+00> : vector<8xf32>
    %50 = vector.multi_reduction <add>, %49, %cst_22 [1] : vector<8x128xf32> to vector<8xf32>
    %51 = vector.shape_cast %50 : vector<8xf32> to vector<8x1xf32>
    %52 = tpu.reciprocal %51 {approx = true} : vector<8x1xf32> -> vector<8x1xf32>
    %53 = vector.broadcast %52 : vector<8x1xf32> to vector<8x128xf32>
    %54 = arith.mulf %49, %53 : vector<8x128xf32>
    %c0_23 = arith.constant 0 : index
    %c0_24 = arith.constant 0 : index
    %55 = vector.load %arg6[%c0_23, %c0_24] : memref<8x128xf32, #tpu.memory_space<vmem>>, vector<8x128xf32>
    tpu.vector_store %arg6[%c0_23, %c0_24], %54 {strides = array<i32>} : memref<8x128xf32, #tpu.memory_space<vmem>>, vector<8x128xf32>,
    return
  }
}

</mosaic_0001>

<bundles_post_ra>
// kernel: tpu_custom_call.1
= control target key start
LH: loop header
LB: loop body
LE: loop exit
PB: predicated region body
PF: predicated region fallthrough
CT: control target
= control target key end

     0   :  { %11 = vsyncpa [#allocation3], 0  ;;  %s982_s0 = inlined_call_operand.hbm [shape: f32[64,300], index: 0, kind: input, shape index: {}]   ;;  %s983_s1 = inlined_call_operand.hbm [shape: f32[300,128], index: 1, kind: input, shape index: {}]   ;;  %s984_s2 = inlined_call_operand.hbm [shape: f32[128,128], index: 2, kind: input, shape index: {}]   ;;  %s985_s3 = inlined_call_operand.vmem [shape: f32[1,128], index: 3, kind: input, shape index: {}]   ;;  %s986_s4 = inlined_call_operand.hbm [shape: f32[128,128], index: 4, kind: input, shape index: {}]   ;;  %s987_s5 = inlined_call_operand.vmem [shape: f32[1,128], index: 5, kind: input, shape index: {}]   ;;  %s988_s6 = inlined_call_operand.hbm [shape: f32[8,128], index: 6, kind: output, shape index: {}]  }
   0x1   :  { %12 = vsyncpa [#allocation6], 0 }
   0x2   :  { %13 = vsyncpa [#allocation9], 0  ;;  %s32_s23 = sshll.u32 %s983_s1, 4  ;;  %s33_s23 = int_to_ptr.hbm [resolvable:$true] %s32_s23 }
   0x3   :  { %14 = vsyncpa [#allocation4], 0  ;;  %s735_s24 = smov [#allocation5]   ;;  %s19_s28 = sshll.u32 %s982_s0, 4  ;;  %s20_s28 = int_to_ptr.hbm [resolvable:$true] %s19_s28 }
   0x4   :  { %s34_s25 = sshll.u32 %s735_s24, 4  ;;  %s736_s29 = smov 128   ;;  %s35_s25 = int_to_ptr.vmem [resolvable:$true] %s34_s25 }
   0x5   :  { %s737_s30 = smov 8   ;;  %s738_s7 = smov [#allocation2]  }
   0x6   :  { %40 = dma.hbm_to_vmem [thread:$0]  %s33_s23, 4864, %s35_s25, [#allocation6], %s736_s29, %s736_s29, %s737_s30  }
   0x7   :  { %s21_s8 = sshll.u32 %s738_s7, 4  ;;  %s739_s9 = smov 384   ;;  %s22_s8 = int_to_ptr.vmem [resolvable:$true] %s21_s8 }
   0x8   :  { %s740_s10 = smov 24   ;;  %s45_s12 = sshll.u32 %s984_s2, 4  ;;  %s46_s12 = int_to_ptr.hbm [resolvable:$true] %s45_s12 }
   0x9   :  { %27 = dma.hbm_to_vmem [thread:$0]  %s20_s28, 3072, %s22_s8, [#allocation3], %s739_s9, %s739_s9, %s740_s10  }
   0xa   :  { %s741_s13 = smov [#allocation7]   ;;  %s60_s16 = sshll.u32 %s986_s4, 4  ;;  %s61_s16 = int_to_ptr.hbm [resolvable:$true] %s60_s16 }
   0xb   :  { %s47_s14 = sshll.u32 %s741_s13, 4  ;;  %s742_s17 = smov [#allocation8]   ;;  %s48_s14 = int_to_ptr.vmem [resolvable:$true] %s47_s14 }
   0xc   :  { %53 = dma.hbm_to_vmem [thread:$0]  %s46_s12, 2048, %s48_s14, [#allocation6], %s736_s29, %s736_s29, %s737_s30  }
   0xd   :  { %s62_s18 = sshll.u32 %s742_s17, 4  ;;  %s63_s18 = int_to_ptr.vmem [resolvable:$true] %s62_s18 }
   0xe   :  { %68 = dma.hbm_to_vmem [thread:$0]  %s61_s16, 2048, %s63_s18, [#allocation9], %s736_s29, %s736_s29, %s737_s30  }
   0xf   :  { %727 = dma.done.wait [#allocation3], 3072  }
  0x10   :  { %728 = vsyncadd [#allocation3], 4294964224 }
  0x11   :  { %729 = dma.done.wait [#allocation6], 6912  }
  0x12   :  { %730 = vsyncadd [#allocation6], 4294960384 }
  0x13   :  { %731 = dma.done.wait [#allocation9], 2048  }
  0x14   :  { %732 = vsyncadd [#allocation9], 4294965248  ;;  %v126_v0 = vld [vmem:[#allocation5 + $0x78] sm:$0xff]  ;;  %v792_v1 = vld [vmem:[#allocation7 + $0x78] sm:$0xff]  ;;  %vm178_vm0 = vcmask 1043456   ;;  %vm153_vm1 = vcmask 359424  }
  0x15   :  { %v125_v2 = vld [vmem:[#allocation5 + $0x70] sm:$0xff]  ;;  %182 = vmatpush.msra.mxu0 %v126_v0  ;;  %321 = vmatpush.msra.mxu3 %v792_v1  ;;  %v142_v3 = vld [vmem:[#allocation5 + $0xf8] sm:$0xff]  ;;  %v795_v4 = vld [vmem:[#allocation7 + $0x70] sm:$0xff]  ;;  %v743_v57 = vmov 0.0   ;;  %s744_s20 = smov [#allocation10]   ;;  %s554_s24 = sshll.u32 %s988_s6, 4  ;;  %s555_s24 = int_to_ptr.hbm [resolvable:$true] %s554_s24 }
  0x16   :  { %223 = vmatpush.msra.mxu1 %v142_v3  ;;  %v124_v5 = vld [vmem:[#allocation5 + $0x68] sm:$0xff]  ;;  %v141_v6 = vld [vmem:[#allocation5 + $0xf0] sm:$0xff]  ;;  %v797_v7 = vld [vmem:[#allocation7 + $0x68] sm:$0xff]  ;;  %s552_s21 = sshll.u32 %s744_s20, 4  ;;  %s553_s21 = int_to_ptr.vmem [resolvable:$true] %s552_s21 }
  0x17   :  { %183 = vmatpush.msra.mxu0 %v125_v2  ;;  %322 = vmatpush.msra.mxu3 %v795_v4  ;;  %v140_v8 = vld [vmem:[#allocation5 + $0xe8] sm:$0xff]  ;;  %v123_v9 = vld [vmem:[#allocation5 + $0x60] sm:$0xff]  ;;  %v800_v10 = vld [vmem:[#allocation7 + $0x60] sm:$0xff] }
  0x18   :  { %224 = vmatpush.msra.mxu1 %v141_v6  ;;  %v139_v11 = vld [vmem:[#allocation5 + $0xe0] sm:$0xff]  ;;  %v122_v12 = vld [vmem:[#allocation5 + $0x58] sm:$0xff]  ;;  %v803_v13 = vld [vmem:[#allocation7 + $0x58] sm:$0xff] }
  0x19   :  { %184 = vmatpush.msra.mxu0 %v124_v5  ;;  %323 = vmatpush.msra.mxu3 %v797_v7  ;;  %v138_v14 = vld [vmem:[#allocation5 + $0xd8] sm:$0xff]  ;;  %v121_v15 = vld [vmem:[#allocation5 + $0x50] sm:$0xff]  ;;  %v806_v16 = vld [vmem:[#allocation7 + $0x50] sm:$0xff] }
  0x1a   :  { %225 = vmatpush.msra.mxu1 %v140_v8  ;;  %v137_v17 = vld [vmem:[#allocation5 + $0xd0] sm:$0xff]  ;;  %v148_v18 = vld [vmem:[#allocation5 + $0x128] sm:$0xf]  ;;  %v809_v20 = vld [vmem:[#allocation7 + $0x48] sm:$0xff] }
  0x1b   :  { %185 = vmatpush.msra.mxu0 %v123_v9  ;;  %324 = vmatpush.msra.mxu3 %v800_v10  ;;  %v120_v19 = vld [vmem:[#allocation5 + $0x48] sm:$0xff]  ;;  %v147_v21 = vld [vmem:[#allocation5 + $0x120] sm:$0xff]  ;;  %v812_v24 = vld [vmem:[#allocation7 + $0x40] sm:$0xff] }
  0x1c   :  { %226 = vmatpush.msra.mxu1 %v139_v11  ;;  %566 = vmatpush.msk.msra.mxu2 %vm178_vm0, %v148_v18  ;;  %v136_v22 = vld [vmem:[#allocation5 + $0xc8] sm:$0xff]  ;;  %v119_v23 = vld [vmem:[#allocation5 + $0x40] sm:$0xff]  ;;  %v146_v25 = vld [vmem:[#allocation5 + $0x118] sm:$0xff] }
  0x1d   :  { %186 = vmatpush.msra.mxu0 %v122_v12  ;;  %325 = vmatpush.msra.mxu3 %v803_v13  ;;  %v135_v26 = vld [vmem:[#allocation5 + $0xc0] sm:$0xff]  ;;  %v145_v27 = vld [vmem:[#allocation5 + $0x110] sm:$0xff]  ;;  %v118_v28 = vld [vmem:[#allocation5 + $0x38] sm:$0xff] }
  0x1e   :  { %227 = vmatpush.msra.mxu1 %v138_v14  ;;  %275 = vmatpush.msra.mxu2 %v147_v21  ;;  %v815_v29 = vld [vmem:[#allocation7 + $0x38] sm:$0xff]  ;;  %v134_v30 = vld [vmem:[#allocation5 + $0xb8] sm:$0xff]  ;;  %v117_v32 = vld [vmem:[#allocation5 + $0x30] sm:$0xff] }
  0x1f   :  { %187 = vmatpush.msra.mxu0 %v121_v15  ;;  %326 = vmatpush.msra.mxu3 %v806_v16  ;;  %v144_v31 = vld [vmem:[#allocation5 + $0x108] sm:$0xff]  ;;  %v818_v33 = vld [vmem:[#allocation7 + $0x30] sm:$0xff]  ;;  %v133_v34 = vld [vmem:[#allocation5 + $0xb0] sm:$0xff] }
  0x20   :  { %228 = vmatpush.msra.mxu1 %v137_v17  ;;  %276 = vmatpush.msra.mxu2 %v146_v25  ;;  %v143_v35 = vld [vmem:[#allocation5 + $0x100] sm:$0xff]  ;;  %v116_v36 = vld [vmem:[#allocation5 + $0x28] sm:$0xff]  ;;  %v821_v37 = vld [vmem:[#allocation7 + $0x28] sm:$0xff] }
  0x21   :  { %188 = vmatpush.msra.mxu0 %v120_v19  ;;  %327 = vmatpush.msra.mxu3 %v809_v20  ;;  %v132_v38 = vld [vmem:[#allocation5 + $0xa8] sm:$0xff]  ;;  %v89_v39 = vld [vmem:[#allocation2 + $0x10] sm:$0xff]  ;;  %v115_v40 = vld [vmem:[#allocation5 + $0x20] sm:$0xff] }
  0x22   :  { %229 = vmatpush.msra.mxu1 %v136_v22  ;;  %277 = vmatpush.msra.mxu2 %v145_v27  ;;  %v824_v41 = vld [vmem:[#allocation7 + $0x20] sm:$0xff]  ;;  %v131_v42 = vld [vmem:[#allocation5 + $0xa0] sm:$0xff]  ;;  %v114_v43 = vld [vmem:[#allocation5 + $0x18] sm:$0xff] }
  0x23   :  { %189 = vmatpush.msra.mxu0 %v119_v23  ;;  %328 = vmatpush.msra.mxu3 %v812_v24  ;;  %v827_v44 = vld [vmem:[#allocation7 + $0x18] sm:$0xff]  ;;  %v130_v45 = vld [vmem:[#allocation5 + $0x98] sm:$0xff]  ;;  %v113_v46 = vld [vmem:[#allocation5 + $0x10] sm:$0xff] }
  0x24   :  { %230 = vmatpush.msra.mxu1 %v135_v26  ;;  %278 = vmatpush.msra.mxu2 %v144_v31  ;;  %v831_v47 = vld [vmem:[#allocation7 + $0x10] sm:$0xff]  ;;  %v129_v48 = vld [vmem:[#allocation5 + $0x90] sm:$0xff]  ;;  %v112_v49 = vld [vmem:[#allocation5 + $0x8] sm:$0xff] }
  0x25   :  { %190 = vmatpush.msra.mxu0 %v118_v28  ;;  %329 = vmatpush.msra.mxu3 %v815_v29  ;;  %v835_v50 = vld [vmem:[#allocation7 + $0x8] sm:$0xff]  ;;  %v128_v51 = vld [vmem:[#allocation5 + $0x88] sm:$0xff]  ;;  %v111_v52 = vld [vmem:[#allocation5] sm:$0xff] }
  0x26   :  { %231 = vmatpush.msra.mxu1 %v134_v30  ;;  %279 = vmatpush.msra.mxu2 %v143_v35  ;;  %v839_v53 = vld [vmem:[#allocation7] sm:$0xff]  ;;  %v87_v54 = vld [vmem:[#allocation2] sm:$0xff]  ;;  %v88_v56 = vld [vmem:[#allocation2 + $0x8] sm:$0xff] }
  0x27   :  { %191 = vmatpush.msra.mxu0 %v117_v32  ;;  %330 = vmatpush.msra.mxu3 %v818_v33  ;;  %v127_v55 = vld [vmem:[#allocation5 + $0x80] sm:$0xff]  ;;  %v92_v58 = vld [vmem:[#allocation2 + $0x28] sm:$0xff]  ;;  %v90_v59 = vld [vmem:[#allocation2 + $0x18] sm:$0xff] }
  0x28   :  { %232 = vmatpush.msra.mxu1 %v133_v34  ;;  %567 = vmatmul.msk.f32.vlgmr.msra.gmra.mxu2 %vm153_vm1, %v89_v39  ;;  %v91_v60 = vld [vmem:[#allocation2 + $0x20] sm:$0xff]  ;;  %v93_v62 = vld [vmem:[#allocation2 + $0x30] sm:$0xff]  ;;  %v94_v63 = vld [vmem:[#allocation2 + $0x38] sm:$0xff] }
  0x29   :  { %192 = vmatpush.msra.mxu0 %v116_v36  ;;  %331 = vmatpush.msra.mxu3 %v821_v37  ;;  %v95_v61 = vld [vmem:[#allocation2 + $0x40] sm:$0xff]  ;;  %v98_v0 = vld [vmem:[#allocation2 + $0x58] sm:$0xff]  ;;  %v97_v3 = vld [vmem:[#allocation2 + $0x50] sm:$0xff] }
  0x2a   :  { %233 = vmatpush.msra.mxu1 %v132_v38  ;;  %365 = vmatpush.msrb.mxu2 %v792_v1  ;;  %v959_v2 = vld [vmem:[%s985_s3] ss:$0 sm:$0xff]  ;;  %v104_v15 = vld [vmem:[#allocation2 + $0x88] sm:$0xff]  ;;  %v106_v21 = vld [vmem:[#allocation2 + $0x98] sm:$0xff] }
  0x2b   :  { %193 = vmatpush.msra.mxu0 %v115_v40  ;;  %332 = vmatpush.msra.mxu3 %v824_v41  ;;  %v99_v5 = vld [vmem:[#allocation2 + $0x60] sm:$0xff]  ;;  %v110_v22 = vld [vmem:[#allocation2 + $0xb8] sm:$0xff]  ;;  %v108_v26 = vld [vmem:[#allocation2 + $0xa8] sm:$0xff] }
  0x2c   :  { %234 = vmatpush.msra.mxu1 %v131_v42  ;;  %366 = vmatpush.msrb.mxu2 %v795_v4  ;;  %v103_v17 = vld [vmem:[#allocation2 + $0x80] sm:$0xff]  ;;  %v109_v27 = vld [vmem:[#allocation2 + $0xb0] sm:$0xff] }
  0x2d   :  { %194 = vmatpush.msra.mxu0 %v114_v43  ;;  %333 = vmatpush.msra.mxu3 %v827_v44  ;;  %v107_v19 = vld [vmem:[#allocation2 + $0xa0] sm:$0xff] }
  0x2e   :  { %235 = vmatpush.msra.mxu1 %v130_v45  ;;  %367 = vmatpush.msrb.mxu2 %v797_v7 }
  0x2f   :  { %195 = vmatpush.msra.mxu0 %v113_v46  ;;  %334 = vmatpush.msra.mxu3 %v831_v47 }
  0x30   :  { %236 = vmatpush.msra.mxu1 %v129_v48  ;;  %368 = vmatpush.msrb.mxu2 %v800_v10 }
  0x31   :  { %196 = vmatpush.msra.mxu0 %v112_v49  ;;  %335 = vmatpush.msra.mxu3 %v835_v50 }
  0x32   :  { %237 = vmatpush.msra.mxu1 %v128_v51  ;;  %369 = vmatpush.msrb.mxu2 %v803_v13 }
  0x33   :  { %197 = vmatpush.msra.mxu0 %v111_v52  ;;  %336 = vmatpush.msra.mxu3 %v839_v53 }
  0x34   :  { %198 = vmatmul.f32.vlgmr.msra.gmra.mxu0 %v87_v54  ;;  %337 = vmatmul.f32.vlgmr.msra.gmra.mxu3 %v743_v57 }
  0x35   :  { %238 = vmatpush.msra.mxu1 %v127_v55  ;;  %343 = vmatpush.msrb.mxu3 %v792_v1 }
  0x36   :  { %239 = vmatmul.f32.vlgmr.msra.gmra.mxu1 %v88_v56  ;;  %387 = vmatpush.msrb.mxu0 %v792_v1 }
  0x37   :  { %344 = vmatpush.msrb.mxu3 %v795_v4  ;;  %370 = vmatpush.msrb.mxu2 %v806_v16 }
  0x38   :  { %409 = vmatpush.msrb.mxu1 %v792_v1  ;;  %388 = vmatpush.msrb.mxu0 %v795_v4 }
  0x39   :  { %345 = vmatpush.msrb.mxu3 %v797_v7  ;;  %371 = vmatpush.msrb.mxu2 %v809_v20 }
  0x3a   :  { %410 = vmatpush.msrb.mxu1 %v795_v4  ;;  %389 = vmatpush.msrb.mxu0 %v797_v7 }
  0x3b   :  { %346 = vmatpush.msrb.mxu3 %v800_v10  ;;  %372 = vmatpush.msrb.mxu2 %v812_v24 }
  0x3c   :  { %411 = vmatpush.msrb.mxu1 %v797_v7  ;;  %390 = vmatpush.msrb.mxu0 %v800_v10 }
  0x3d   :  { %347 = vmatpush.msrb.mxu3 %v803_v13  ;;  %373 = vmatpush.msrb.mxu2 %v815_v29 }
  0x3e   :  { %412 = vmatpush.msrb.mxu1 %v800_v10  ;;  %391 = vmatpush.msrb.mxu0 %v803_v13 }
  0x3f   :  { %348 = vmatpush.msrb.mxu3 %v806_v16  ;;  %374 = vmatpush.msrb.mxu2 %v818_v33 }
  0x40   :  { %413 = vmatpush.msrb.mxu1 %v803_v13  ;;  %392 = vmatpush.msrb.mxu0 %v806_v16 }
  0x41   :  { %349 = vmatpush.msrb.mxu3 %v809_v20  ;;  %375 = vmatpush.msrb.mxu2 %v821_v37 }
  0x42   :  { %414 = vmatpush.msrb.mxu1 %v806_v16  ;;  %393 = vmatpush.msrb.mxu0 %v809_v20 }
  0x43   :  { %350 = vmatpush.msrb.mxu3 %v812_v24  ;;  %376 = vmatpush.msrb.mxu2 %v824_v41 }
  0x44   :  { %415 = vmatpush.msrb.mxu1 %v809_v20  ;;  %394 = vmatpush.msrb.mxu0 %v812_v24 }
  0x45   :  { %351 = vmatpush.msrb.mxu3 %v815_v29  ;;  %377 = vmatpush.msrb.mxu2 %v827_v44 }
  0x46   :  { %416 = vmatpush.msrb.mxu1 %v812_v24  ;;  %395 = vmatpush.msrb.mxu0 %v815_v29 }
  0x47   :  { %352 = vmatpush.msrb.mxu3 %v818_v33  ;;  %378 = vmatpush.msrb.mxu2 %v831_v47 }
  0x48   :  { %417 = vmatpush.msrb.mxu1 %v815_v29  ;;  %396 = vmatpush.msrb.mxu0 %v818_v33 }
  0x49   :  { %353 = vmatpush.msrb.mxu3 %v821_v37  ;;  %379 = vmatpush.msrb.mxu2 %v835_v50 }
  0x4a   :  { %418 = vmatpush.msrb.mxu1 %v818_v33  ;;  %397 = vmatpush.msrb.mxu0 %v821_v37 }
  0x4b   :  { %354 = vmatpush.msrb.mxu3 %v824_v41  ;;  %380 = vmatpush.msrb.mxu2 %v839_v53 }
  0x4c   :  { %419 = vmatpush.msrb.mxu1 %v821_v37  ;;  %398 = vmatpush.msrb.mxu0 %v824_v41 }
  0x4d   :  { %355 = vmatpush.msrb.mxu3 %v827_v44  ;;  %453 = vmatpush.msra.mxu2 %v792_v1 }
  0x4e   :  { %420 = vmatpush.msrb.mxu1 %v824_v41  ;;  %399 = vmatpush.msrb.mxu0 %v827_v44 }
  0x4f   :  { %356 = vmatpush.msrb.mxu3 %v831_v47  ;;  %454 = vmatpush.msra.mxu2 %v795_v4 }
  0x50   :  { %421 = vmatpush.msrb.mxu1 %v827_v44  ;;  %400 = vmatpush.msrb.mxu0 %v831_v47 }
  0x51   :  { %357 = vmatpush.msrb.mxu3 %v835_v50  ;;  %455 = vmatpush.msra.mxu2 %v797_v7 }
  0x52   :  { %422 = vmatpush.msrb.mxu1 %v831_v47  ;;  %401 = vmatpush.msrb.mxu0 %v835_v50 }
  0x53   :  { %358 = vmatpush.msrb.mxu3 %v839_v53  ;;  %456 = vmatpush.msra.mxu2 %v800_v10 }
  0x54   :  { %423 = vmatpush.msrb.mxu1 %v835_v50  ;;  %402 = vmatpush.msrb.mxu0 %v839_v53 }
  0x55   :  { %431 = vmatpush.msra.mxu3 %v792_v1  ;;  %457 = vmatpush.msra.mxu2 %v803_v13 }
  0x56   :  { %424 = vmatpush.msrb.mxu1 %v839_v53  ;;  %475 = vmatpush.msra.mxu0 %v792_v1  ;;  %v96_v1 = vld [vmem:[#allocation2 + $0x48] sm:$0xff] }
  0x57   :  { %432 = vmatpush.msra.mxu3 %v795_v4  ;;  %458 = vmatpush.msra.mxu2 %v806_v16 }
  0x58   :  { %476 = vmatpush.msra.mxu0 %v795_v4  ;;  %568 = vmatmul.msk.f32.gmra.mxu2 %vm153_vm1, %v92_v58  ;;  %v101_v4 = vld [vmem:[#allocation2 + $0x70] sm:$0xff] }
  0x59   :  { %433 = vmatpush.msra.mxu3 %v797_v7  ;;  %459 = vmatpush.msra.mxu2 %v809_v20 }
  0x5a   :  { %477 = vmatpush.msra.mxu0 %v797_v7  ;;  %242 = vmatmul.f32.gmra.mxu1 %v91_v60 }
  0x5b   :  { %434 = vmatpush.msra.mxu3 %v800_v10  ;;  %460 = vmatpush.msra.mxu2 %v812_v24 }
  0x5c   :  { %478 = vmatpush.msra.mxu0 %v800_v10 }
  0x5d   :  { %435 = vmatpush.msra.mxu3 %v803_v13  ;;  %461 = vmatpush.msra.mxu2 %v815_v29 }
  0x5e   :  { %479 = vmatpush.msra.mxu0 %v803_v13  ;;  %v100_v13 = vld [vmem:[#allocation2 + $0x68] sm:$0xff] }
  0x5f   :  { %436 = vmatpush.msra.mxu3 %v806_v16  ;;  %462 = vmatpush.msra.mxu2 %v818_v33 }
  0x60   :  { %480 = vmatpush.msra.mxu0 %v806_v16  ;;  %569 = vmatmul.msk.f32.gmra.mxu2 %vm153_vm1, %v95_v61  ;;  %v102_v16 = vld [vmem:[#allocation2 + $0x78] sm:$0xff] }
  0x61   :  { %437 = vmatpush.msra.mxu3 %v809_v20  ;;  %463 = vmatpush.msra.mxu2 %v821_v37 }
  0x62   :  { %481 = vmatpush.msra.mxu0 %v809_v20  ;;  %245 = vmatmul.f32.gmra.mxu1 %v94_v63  ;;  %v105_v20 = vld [vmem:[#allocation2 + $0x90] sm:$0xff] }
  0x63   :  { %438 = vmatpush.msra.mxu3 %v812_v24  ;;  %464 = vmatpush.msra.mxu2 %v824_v41 }
  0x64   :  { %482 = vmatpush.msra.mxu0 %v812_v24 }
  0x65   :  { %439 = vmatpush.msra.mxu3 %v815_v29  ;;  %465 = vmatpush.msra.mxu2 %v827_v44 }
  0x66   :  { %483 = vmatpush.msra.mxu0 %v815_v29 }
  0x67   :  { %440 = vmatpush.msra.mxu3 %v818_v33  ;;  %466 = vmatpush.msra.mxu2 %v831_v47 }
  0x68   :  { %484 = vmatpush.msra.mxu0 %v818_v33  ;;  %570 = vmatmul.msk.f32.gmra.mxu2 %vm153_vm1, %v98_v0 }
  0x69   :  { %441 = vmatpush.msra.mxu3 %v821_v37  ;;  %467 = vmatpush.msra.mxu2 %v835_v50 }
  0x6a   :  { %485 = vmatpush.msra.mxu0 %v821_v37  ;;  %248 = vmatmul.f32.gmra.mxu1 %v97_v3 }
  0x6b   :  { %442 = vmatpush.msra.mxu3 %v824_v41  ;;  %468 = vmatpush.msra.mxu2 %v839_v53 }
  0x6c   :  { %486 = vmatpush.msra.mxu0 %v824_v41 }
  0x6d   :  { %443 = vmatpush.msra.mxu3 %v827_v44  ;;  %201 = vmatmul.f32.gmra.mxu0 %v90_v59 }
  0x6e   :  { %487 = vmatpush.msra.mxu0 %v827_v44 }
  0x6f   :  { %444 = vmatpush.msra.mxu3 %v831_v47 }
  0x70   :  { %488 = vmatpush.msra.mxu0 %v831_v47  ;;  %571 = vmatmul.msk.f32.gmra.mxu2 %vm153_vm1, %v101_v4 }
  0x71   :  { %445 = vmatpush.msra.mxu3 %v835_v50 }
  0x72   :  { %489 = vmatpush.msra.mxu0 %v835_v50  ;;  %251 = vmatmul.f32.gmra.mxu1 %v100_v13 }
  0x73   :  { %446 = vmatpush.msra.mxu3 %v839_v53 }
  0x74   :  { %490 = vmatpush.msra.mxu0 %v839_v53 }
  0x75   :  { %204 = vmatmul.f32.gmra.mxu0 %v93_v62 }
  0x78   :  { %572 = vmatmul.msk.f32.gmra.mxu2 %vm153_vm1, %v104_v15 }
  0x7a   :  { %254 = vmatmul.f32.gmra.mxu1 %v103_v17  ;;  %v511_v17 = vld [vmem:[#allocation8 + $0x70] sm:$0xff] }
  0x7d   :  { %207 = vmatmul.f32.gmra.mxu0 %v96_v1 }
  0x80   :  { %573 = vmatmul.msk.f32.gmra.mxu2 %vm153_vm1, %v107_v19  ;;  %v509_v19 = vld [vmem:[#allocation8 + $0x60] sm:$0xff] }
  0x82   :  { %257 = vmatmul.f32.gmra.mxu1 %v106_v21  ;;  %v507_v21 = vld [vmem:[#allocation8 + $0x50] sm:$0xff] }
  0x85   :  { %210 = vmatmul.f32.gmra.mxu0 %v99_v5 }
  0x88   :  { %574 = vmatmul.msk.f32.gmra.mxu2 %vm153_vm1, %v110_v22  ;;  %v506_v22 = vld [vmem:[#allocation8 + $0x48] sm:$0xff] }
  0x8a   :  { %260 = vmatmul.f32.gmra.mxu1 %v109_v27 }
  0x8d   :  { %213 = vmatmul.f32.gmra.mxu0 %v102_v16  ;;  %v512_v16 = vld [vmem:[#allocation8 + $0x78] sm:$0xff] }
  0x8e   :  { %517 = vmatpush.msra.mxu1 %v512_v16 }
  0x90   :  { %518 = vmatpush.msra.mxu1 %v511_v17 }
  0x95   :  { %216 = vmatmul.f32.gmra.mxu0 %v105_v20  ;;  %v508_v20 = vld [vmem:[#allocation8 + $0x58] sm:$0xff] }
  0x9d   :  { %219 = vmatmul.f32.gmra.mxu0 %v108_v26  ;;  %v502_v26 = vld [vmem:[#allocation8 + $0x28] sm:$0xff] }
  0xab   :  { %v281_v9 = vpop.f32.mrf.mxu2 }
  0xb1   :  { %v199_v6 = vpop.f32.mrf.mxu0 }
  0xb2   :  { %v200_v7 = vadd.f32 %v959_v2, %v199_v6 }
  0xb3   :  { %v240_v8 = vpop.f32.mrf.mxu1 }
  0xb4   :  { %v241_v10 = vadd.f32 %v240_v8, %v200_v7 }
  0xb6   :  { %v282_v11 = vadd.f32 %v281_v9, %v241_v10 }
  0xb7   :  { %v338_v12 = vpop.f32.mrf.mxu3 }
  0xb8   :  { %v341_v14 = vadd.f32 %v338_v12, %v282_v11 }
  0xba   :  { %587 = vtanh.f32 %v341_v14 }
  0xc0   :  { %v588_v18 = vpop.eup %587 }
  0xc1   :  { %359 = vmatmul.f32.vlgmr.msrb.gmra.mxu3 %v588_v18  ;;  %v510_v18 = vld [vmem:[#allocation8 + $0x68] sm:$0xff] }
  0xc2   :  { %519 = vmatpush.msra.mxu1 %v510_v18 }
  0xc4   :  { %520 = vmatpush.msra.mxu1 %v509_v19 }
  0xc6   :  { %521 = vmatpush.msra.mxu1 %v508_v20 }
  0xc8   :  { %522 = vmatpush.msra.mxu1 %v507_v21 }
  0xca   :  { %523 = vmatpush.msra.mxu1 %v506_v22 }
  0xd7   :  { %v243_v24 = vpop.f32.mrf.mxu1 }
  0xdb   :  { %v284_v25 = vpop.f32.mrf.mxu2 }
  0xdf   :  { %v246_v29 = vpop.f32.mrf.mxu1 }
  0xe3   :  { %v287_v30 = vpop.f32.mrf.mxu2 }
  0xe7   :  { %v249_v32 = vpop.f32.mrf.mxu1 }
  0xea   :  { %v202_v23 = vpop.f32.mrf.mxu0 }
  0xeb   :  { %v290_v33 = vpop.f32.mrf.mxu2  ;;  %v203_v34 = vadd.f32 %v959_v2, %v202_v23  ;;  %v505_v23 = vld [vmem:[#allocation8 + $0x40] sm:$0xff] }
  0xec   :  { %524 = vmatpush.msra.mxu1 %v505_v23 }
  0xed   :  { %v244_v35 = vadd.f32 %v243_v24, %v203_v34  ;;  %v504_v24 = vld [vmem:[#allocation8 + $0x38] sm:$0xff]  ;;  %v497_v34 = vld [vmem:[#allocation8] sm:$0xff] }
  0xee   :  { %525 = vmatpush.msra.mxu1 %v504_v24 }
  0xef   :  { %v252_v37 = vpop.f32.mrf.mxu1  ;;  %v285_v40 = vadd.f32 %v284_v25, %v244_v35  ;;  %v503_v25 = vld [vmem:[#allocation8 + $0x30] sm:$0xff] }
  0xf0   :  { %526 = vmatpush.msra.mxu1 %v503_v25 }
  0xf2   :  { %v205_v28 = vpop.f32.mrf.mxu0  ;;  %527 = vmatpush.msra.mxu1 %v502_v26 }
  0xf3   :  { %v293_v39 = vpop.f32.mrf.mxu2  ;;  %v206_v59 = vadd.f32 %v959_v2, %v205_v28 }
  0xf5   :  { %v247_v60 = vadd.f32 %v246_v29, %v206_v59 }
  0xf7   :  { %v255_v46 = vpop.f32.mrf.mxu1  ;;  %v288_v61 = vadd.f32 %v287_v30, %v247_v60  ;;  %v501_v30 = vld [vmem:[#allocation8 + $0x20] sm:$0xff] }
  0xf8   :  { %528 = vmatpush.msra.mxu1 %v501_v30 }
  0xfa   :  { %v208_v31 = vpop.f32.mrf.mxu0 }
  0xfb   :  { %v296_v48 = vpop.f32.mrf.mxu2  ;;  %v209_v1 = vadd.f32 %v959_v2, %v208_v31  ;;  %v500_v31 = vld [vmem:[#allocation8 + $0x18] sm:$0xff] }
  0xfc   :  { %529 = vmatpush.msra.mxu1 %v500_v31 }
  0xfd   :  { %v250_v4 = vadd.f32 %v249_v32, %v209_v1  ;;  %v499_v32 = vld [vmem:[#allocation8 + $0x10] sm:$0xff] }
  0xfe   :  { %530 = vmatpush.msra.mxu1 %v499_v32 }
  0xff   :  { %v258_v54 = vpop.f32.mrf.mxu1  ;;  %v291_v5 = vadd.f32 %v290_v33, %v250_v4  ;;  %v498_v33 = vld [vmem:[#allocation8 + $0x8] sm:$0xff] }
 0x100   :  { %531 = vmatpush.msra.mxu1 %v498_v33 }
 0x102   :  { %v211_v36 = vpop.f32.mrf.mxu0  ;;  %532 = vmatpush.msra.mxu1 %v497_v34 }
 0x103   :  { %v212_v38 = vadd.f32 %v959_v2, %v211_v36  ;;  %v299_v55 = vpop.f32.mrf.mxu2 }
 0x105   :  { %v253_v41 = vadd.f32 %v252_v37, %v212_v38 }
 0x107   :  { %v294_v42 = vadd.f32 %v293_v39, %v253_v41  ;;  %v261_v9 = vpop.f32.mrf.mxu1  ;;  %v586_v41 = vld [vmem:[%s987_s5] ss:$0 sm:$0xff] }
 0x10a   :  { %v214_v45 = vpop.f32.mrf.mxu0 }
 0x10b   :  { %v215_v47 = vadd.f32 %v959_v2, %v214_v45  ;;  %v970_v58 = vpop.f32.mrf.mxu2 }
 0x10d   :  { %v256_v49 = vadd.f32 %v255_v46, %v215_v47 }
 0x10f   :  { %v297_v50 = vadd.f32 %v296_v48, %v256_v49 }
 0x112   :  { %v217_v52 = vpop.f32.mrf.mxu0 }
 0x113   :  { %v218_v53 = vadd.f32 %v959_v2, %v217_v52 }
 0x115   :  { %v259_v56 = vadd.f32 %v258_v54, %v218_v53 }
 0x117   :  { %v300_v57 = vadd.f32 %v299_v55, %v259_v56 }
 0x11a   :  { %v220_v3 = vpop.f32.mrf.mxu0 }
 0x11b   :  { %v221_v35 = vadd.f32 %v959_v2, %v220_v3 }
 0x11d   :  { %v262_v36 = vadd.f32 %v261_v9, %v221_v35 }
 0x11f   :  { %v303_v37 = vadd.f32 %v970_v58, %v262_v36 }
 0x144   :  { %v360_v43 = vpop.f32.mrf.mxu3 }
 0x145   :  { %v363_v44 = vadd.f32 %v360_v43, %v285_v40 }
 0x147   :  { %589 = vtanh.f32 %v363_v44 }
 0x14d   :  { %v590_v51 = vpop.eup %589 }
 0x14e   :  { %381 = vmatmul.f32.vlgmr.msrb.gmra.mxu2 %v590_v51 }
 0x1d1   :  { %v382_v62 = vpop.f32.mrf.mxu2 }
 0x1d2   :  { %v385_v63 = vadd.f32 %v382_v62, %v288_v61 }
 0x1d4   :  { %591 = vtanh.f32 %v385_v63 }
 0x1da   :  { %v592_v0 = vpop.eup %591 }
 0x1db   :  { %403 = vmatmul.f32.vlgmr.msrb.gmra.mxu0 %v592_v0 }
 0x258   :  { %v404_v6 = vpop.f32.mrf.mxu0 }
 0x259   :  { %v407_v7 = vadd.f32 %v404_v6, %v291_v5 }
 0x25b   :  { %593 = vtanh.f32 %v407_v7 }
 0x261   :  { %v594_v8 = vpop.eup %593 }
 0x262   :  { %425 = vmatmul.f32.vlgmr.msrb.gmra.mxu1 %v594_v8 }
 0x2df   :  { %v426_v10 = vpop.f32.mrf.mxu1 }
 0x2e0   :  { %v429_v11 = vadd.f32 %v426_v10, %v294_v42 }
 0x2e2   :  { %595 = vtanh.f32 %v429_v11 }
 0x2e8   :  { %v596_v12 = vpop.eup %595 }
 0x2e9   :  { %447 = vmatmul.f32.vlgmr.msra.gmra.mxu3 %v596_v12 }
 0x36c   :  { %v448_v13 = vpop.f32.mrf.mxu3 }
 0x36d   :  { %v451_v14 = vadd.f32 %v448_v13, %v297_v50 }
 0x36f   :  { %597 = vtanh.f32 %v451_v14 }
 0x375   :  { %v598_v15 = vpop.eup %597 }
 0x376   :  { %469 = vmatmul.f32.vlgmr.msra.gmra.mxu2 %v598_v15 }
 0x3f9   :  { %v470_v27 = vpop.f32.mrf.mxu2 }
 0x3fa   :  { %v473_v28 = vadd.f32 %v470_v27, %v300_v57 }
 0x3fc   :  { %599 = vtanh.f32 %v473_v28 }
 0x402   :  { %v600_v29 = vpop.eup %599 }
 0x403   :  { %491 = vmatmul.f32.vlgmr.msra.gmra.mxu0 %v600_v29 }
 0x480   :  { %v492_v38 = vpop.f32.mrf.mxu0 }
 0x481   :  { %v495_v39 = vadd.f32 %v492_v38, %v303_v37 }
 0x483   :  { %601 = vtanh.f32 %v495_v39 }
 0x489   :  { %v602_v40 = vpop.eup %601 }
 0x48a   :  { %533 = vmatmul.f32.vlgmr.msra.gmra.mxu1 %v602_v40 }
 0x507   :  { %v534_v42 = vpop.f32.mrf.mxu1 }
 0x508   :  { %v535_v43 = vadd.f32 %v586_v41, %v534_v42 }
 0x50a   :  { %537 = vmax.xlane.f32.xlu0 %v535_v43 }
 0x57d   :  { %v538_v44 = vpop.xlane.xlu0 %537 }
 0x57e   :  { %v539_v45 = vsub.f32 %v535_v43, %v538_v44 }
 0x580   :  { %v540_v46 = vmul.f32 1.442695, %v539_v45 }
 0x582   :  { %603 = vpow2.f32 %v540_v46 }
 0x588   :  { %v604_v2 = vpop.eup %603 }
 0x589   :  { %542 = vadd.xlane.f32.xlu0 %v604_v2 }
 0x5fc   :  { %v543_v47 = vpop.xlane.xlu0 %542 }
 0x5fd   :  { %605 = vrcp.f32 %v543_v47 }
 0x603   :  { %v606_v48 = vpop.eup %605 }
 0x604   :  { %v545_v49 = vmul.f32 %v606_v48, %v604_v2 }
 0x606   :  { %546 = vst [vmem:[#allocation10] sm:$0xff] %v545_v49 }
 0x607   :  { %557 = dma.vmem_to_hbm [thread:$0]  %s553_s21, 128, %s555_s24, [#allocation4]  }
 0x608   :  { %733 = dma.done.wait [#allocation4], 128  }
 0x609   :  { %734 = vsyncadd [#allocation4], 4294967168 }
 0x60a   :  { %562 = vsyncpa [#allocation3], 1 }
 0x60b   :  { %563 = vsyncpa [#allocation6], 1 }
 0x60c   :  { %564 = vsyncpa [#allocation9], 1 }
 0x60d   :  { %565 = vsyncpa [#allocation4], 1 }

</bundles_post_ra>
